<compile_context>
chip_gen: v7x
topology: tpu7x:2x2x1
jax: 0.10.0
libtpu: 0.0.40
codegen_flags: <defaults>
</compile_context>

<pallas_src>
import jax
import jax.numpy as jnp
from jax.experimental import pallas as pl
from jax.experimental.pallas import tpu as pltpu

_LANE = 128
_VMEM_INPUT_BUDGET = 8 * 1024 * 1024   # bytes for 2 inputs x 2 pipeline buffers
_MAX_TILE_ROWS = 32768
_MIN_GRID_STEPS = 4                    # keep both v7x TensorCores busy
_SMALL_BYTES = 1 << 20                 # per-input fast-path threshold
_SMALL_ROWS = 1024


def _round_up(x, m):
    return ((x + m - 1) // m) * m


def _dot_kernel(left_ref, right_ref, out_ref):
    # left_ref, right_ref: [TB, D] VMEM tiles; out_ref: [1, TB] (lane-dense).
    tb, d = left_ref.shape
    l = left_ref[...]
    r = right_ref[...]

    dt = jnp.dtype(l.dtype)
    if dt in (jnp.dtype(jnp.bfloat16), jnp.dtype(jnp.float16)):
        # Native low-precision VPU multiply (v6e/v7x); f32 accumulation below.
        prod = l * r
    else:
        prod = l.astype(jnp.float32) * r.astype(jnp.float32)

    if d >= 2 * _LANE and d % _LANE == 0:
        # VALU partial sums over 128-lane chunks (vreg-aligned slices, no
        # relayout), then a single cross-lane (XLU) reduce per row.
        acc = prod[:, 0:_LANE].astype(jnp.float32)
        for c in range(1, d // _LANE):
            acc = acc + prod[:, c * _LANE:(c + 1) * _LANE].astype(jnp.float32)
        row = jnp.sum(acc, axis=-1)
    else:
        row = jnp.sum(prod.astype(jnp.float32), axis=-1)

    out_ref[0, :] = row.astype(out_ref.dtype)


def _pick_block_b(B, D, itemsize, block_b=None):
    """Batch-tile size: byte-budget driven, sublane-packing aligned, and split
    into >= _MIN_GRID_STEPS tiles for large B so multi-TC chips are used."""
    pack = 8 * max(1, 4 // itemsize)          # 8 f32 / 16 bf16 / 32 int8
    tb_budget = _VMEM_INPUT_BUDGET // (4 * D * itemsize)
    tb_budget = max(pack, (tb_budget // pack) * pack)
    tb_budget = min(tb_budget, _MAX_TILE_ROWS)

    if block_b is not None:
        # Clamp user tile against the VMEM budget and packing multiple.
        tb = max(pack, (min(block_b, tb_budget) // pack) * pack)
    else:
        tb_split = _round_up((B + _MIN_GRID_STEPS - 1) // _MIN_GRID_STEPS, pack)
        tb = min(tb_budget, tb_split)

    tb = min(tb, _round_up(B, pack))
    tb = max(tb, pack)
    return tb


def dot_forward(left_emb, right_emb, r_id=None, *, block_b=None,
                force_pallas=False):
    """Batched dot product: out[b] = sum_d left[b, d] * right[b, d].

    r_id is accepted for API parity with the PyTorch module but is unused.
    """
    assert left_emb.shape == right_emb.shape and left_emb.ndim == 2
    B, D = left_emb.shape
    itemsize = jnp.dtype(left_emb.dtype).itemsize

    # Fast path: the module's real shapes are tiny; an XLA fusion beats any
    # standalone kernel until the inputs are multi-MiB.
    if not force_pallas and (B * D * itemsize <= _SMALL_BYTES or B < _SMALL_ROWS):
        prod = left_emb.astype(jnp.float32) * right_emb.astype(jnp.float32)
        out = jnp.sum(prod, axis=-1).astype(left_emb.dtype)
        return jnp.squeeze(out)

    tb = _pick_block_b(B, D, itemsize, block_b)
    num_tiles = pl.cdiv(B, tb)

    # Explicit VMEM limit: 2 inputs x 2 pipeline buffers + double-buffered
    # lane-dense output row, with headroom; stays well under v7x's 64 MiB.
    footprint = 2 * 2 * tb * D * itemsize + 2 * tb * itemsize
    vmem_limit = min(64 << 20, max(8 << 20, 2 * footprint + (1 << 20)))

    out2d = pl.pallas_call(
        _dot_kernel,
        out_shape=jax.ShapeDtypeStruct((num_tiles, tb), left_emb.dtype),
        grid=(num_tiles,),
        in_specs=[
            pl.BlockSpec((tb, D), lambda i: (i, 0)),
            pl.BlockSpec((tb, D), lambda i: (i, 0)),
        ],
        out_specs=pl.BlockSpec((1, tb), lambda i: (i, 0)),
        compiler_params=pltpu.CompilerParams(
            dimension_semantics=("parallel",),
            vmem_limit_bytes=vmem_limit,
        ),
    )(left_emb, right_emb)

    # Lane-dense [num_tiles, tb] -> [B]; padded tail rows are dropped.
    out = out2d.reshape(-1)[:B]
    # PyTorch's .squeeze() removes all size-1 dims: [B,1,1] -> [B] (or () if B==1)
    return jnp.squeeze(out)


if __name__ == "__main__":
    key = jax.random.PRNGKey(0)
    k1, k2, k3, k4 = jax.random.split(key, 4)

    # Small shapes consistent with the module (batch of embeddings).
    B, D = 8, 32
    left_emb = jax.random.normal(k1, (B, D), dtype=jnp.float32)
    right_emb = jax.random.normal(k2, (B, D), dtype=jnp.float32)
    r_id = jnp.zeros((B,), dtype=jnp.int32)  # unused, matches module signature
    ref = jnp.sum(left_emb * right_emb, axis=-1)

    # Default path (tiny shape -> XLA fast path).
    out_fast = jax.block_until_ready(dot_forward(left_emb, right_emb, r_id))
    assert out_fast.shape == (B,)
    assert jnp.allclose(out_fast, ref, atol=1e-5, rtol=1e-5)

    # Force the Pallas kernel at the same tiny shape (single full-array tile).
    out_k = jax.block_until_ready(
        dot_forward(left_emb, right_emb, r_id, force_pallas=True))
    assert out_k.shape == (B,)
    assert jnp.allclose(out_k, ref, atol=1e-5, rtol=1e-5)

    # Multi-tile path: auto tile pick (>= 4 grid steps), chunked D=256 reduce,
    # partial last tile.
    B2, D2 = 300, 256
    l2 = jax.random.normal(k3, (B2, D2), dtype=jnp.float32)
    r2 = jax.random.normal(k4, (B2, D2), dtype=jnp.float32)
    ref2 = jnp.sum(l2 * r2, axis=-1)
    out2 = jax.block_until_ready(dot_forward(l2, r2, force_pallas=True))
    assert out2.shape == (B2,)
    assert jnp.allclose(out2, ref2, atol=1e-4, rtol=1e-5)

    # Explicit block_b (grid=3, tb=128) regression guard for partial tiles.
    out3 = jax.block_until_ready(
        dot_forward(l2, r2, block_b=128, force_pallas=True))
    assert jnp.allclose(out3, ref2, atol=1e-4, rtol=1e-5)

    # bf16 path: native bf16 product, f32 accumulation.
    l_bf = l2.astype(jnp.bfloat16)
    r_bf = r2.astype(jnp.bfloat16)
    ref_bf = jnp.sum(l_bf.astype(jnp.float32) * r_bf.astype(jnp.float32), axis=-1)
    out_bf = jax.block_until_ready(dot_forward(l_bf, r_bf, force_pallas=True))
    assert out_bf.shape == (B2,)
    assert jnp.allclose(out_bf.astype(jnp.float32), ref_bf, atol=0.5, rtol=0.05)

    print("KERNEL_OK")
</pallas_src>

<mosaic_0001>
module attributes {stable_mosaic.version = 11 : i64} {
  func.func @_dot_kernel(%arg0: i32, %arg1: memref<8x32xf32, #tpu.memory_space<vmem>>, %arg2: memref<8x32xf32, #tpu.memory_space<vmem>>, %arg3: memref<1x8xf32, #tpu.memory_space<vmem>>) attributes {dimension_semantics = [#tpu.dimension_semantics<parallel>], iteration_bounds = array<i64: 1>, scalar_prefetch = 0 : i64, scratch_operands = 0 : i64, tpu.core_type = #tpu.core_type<tc>, window_params = [{transform_indices = @transform_0, window_bounds = array<i64: 8, 32>}, {transform_indices = @transform_1, window_bounds = array<i64: 8, 32>}, {transform_indices = @transform_2, window_bounds = array<i64: 1, 8>}]} {
    %c0 = arith.constant 0 : index
    %c0_0 = arith.constant 0 : index
    %0 = vector.load %arg1[%c0, %c0_0] : memref<8x32xf32, #tpu.memory_space<vmem>>, vector<8x32xf32>
    %c0_1 = arith.constant 0 : index
    %c0_2 = arith.constant 0 : index
    %1 = vector.load %arg2[%c0_1, %c0_2] : memref<8x32xf32, #tpu.memory_space<vmem>>, vector<8x32xf32>
    %2 = arith.mulf %0, %1 : vector<8x32xf32>
    %cst = arith.constant dense<0.000000e+00> : vector<8xf32>
    %3 = vector.multi_reduction <add>, %2, %cst [1] : vector<8x32xf32> to vector<8xf32>
    %c0_3 = arith.constant 0 : index
    %c0_4 = arith.constant 0 : index
    %4 = vector.load %arg3[%c0_3, %c0_4] : memref<1x8xf32, #tpu.memory_space<vmem>>, vector<1x8xf32>
    %5 = vector.shape_cast %4 : vector<1x8xf32> to vector<8xf32>
    %6 = vector.shape_cast %3 : vector<8xf32> to vector<1x8xf32>
    tpu.vector_store %arg3[%c0_3, %c0_4], %6 {strides = array<i32>} : memref<1x8xf32, #tpu.memory_space<vmem>>, vector<1x8xf32>,
    return
  }
  func.func @transform_0(%arg0: i32) -> (i32, i32) {
    %c0_i32 = arith.constant 0 : i32
    %c0_i32_0 = arith.constant 0 : i32
    return %arg0, %c0_i32 : i32, i32
  }
  func.func @transform_1(%arg0: i32) -> (i32, i32) {
    %c0_i32 = arith.constant 0 : i32
    %c0_i32_0 = arith.constant 0 : i32
    return %arg0, %c0_i32 : i32, i32
  }
  func.func @transform_2(%arg0: i32) -> (i32, i32) {
    %c0_i32 = arith.constant 0 : i32
    %c0_i32_0 = arith.constant 0 : i32
    return %arg0, %c0_i32 : i32, i32
  }
}

</mosaic_0001>

<bundles_post_ra>
// kernel: tpu_custom_call.1
= control target key start
LH: loop header
LB: loop body
LE: loop exit
PB: predicated region body
PF: predicated region fallthrough
CT: control target
= control target key end

     0   :  { %7 = vsyncpa [#allocation3], 0  ;;  %s198_s0 = inlined_call_operand.hbm [shape: f32[8,32], index: 0, kind: input, shape index: {}]   ;;  %s199_s1 = inlined_call_operand.hbm [shape: f32[8,32], index: 1, kind: input, shape index: {}]   ;;  %s200_s2 = inlined_call_operand.hbm [shape: f32[1,8], index: 2, kind: output, shape index: {}]  }
   0x1   :  { %8 = vsyncpa [#allocation6], 0 }
   0x2   :  { %9 = vsyncpa [#allocation4], 0  ;;  %s144_s9 = smov [#allocation2]   ;;  %s145_s11 = smov [#allocation5]  }
   0x3   :  { %s16_s10 = sshll.u32 %s144_s9, 4  ;;  %s26_s12 = sshll.u32 %s145_s11, 4  ;;  %s17_s10 = int_to_ptr.vmem [resolvable:$true] %s16_s10  ;;  %s27_s12 = int_to_ptr.vmem [resolvable:$true] %s26_s12 }
   0x4   :  { %s72_s15 = scalar_lea.hbm %s198_s0, 128 }
   0x5   :  { %p73_p0 = scmp.ne.s32.totalorder %s198_s0, %s72_s15  ;;  %p76_p1 = scmp.lt.u32.totalorder %s72_s15, %s198_s0 }
   0x7   :  { %p78_p2 = pnand %p76_p1, %p73_p0 }
   0x9   :  { %81 = shalt.err (!%p78_p2)
}
   0xa   :  { %s82_s20 = scalar_lea.vmem %s17_s10, 128  ;;  %p87_p4 = scmp.lt.s32.totalorder %s17_s10, %s17_s10 }
   0xb   :  { %p83_p3 = scmp.ne.s32.totalorder %s17_s10, %s82_s20  ;;  %p88_p5 = scmp.lt.s32.totalorder %s82_s20, %s82_s20 }
   0xd   :  { %p89_p6 = por %p88_p5, %p87_p4 }
   0xf   :  { %p90_p7 = pnand %p89_p6, %p83_p3 }
  0x11   :  { %93 = shalt.err (!%p90_p7)
}
  0x12   :  { %19 = dma.hbm_to_vmem [thread:$0]  %s198_s0, 128, %s17_s10, [#allocation3]  }
  0x13   :  { %s94_s25 = scalar_lea.hbm %s199_s1, 128 }
  0x14   :  { %p95_p8 = scmp.ne.s32.totalorder %s199_s1, %s94_s25  ;;  %p98_p9 = scmp.lt.u32.totalorder %s94_s25, %s199_s1 }
  0x16   :  { %p100_p10 = pnand %p98_p9, %p95_p8 }
  0x18   :  { %103 = shalt.err (!%p100_p10)
}
  0x19   :  { %s104_s30 = scalar_lea.vmem %s27_s12, 128  ;;  %p109_p12 = scmp.lt.s32.totalorder %s27_s12, %s27_s12 }
  0x1a   :  { %p105_p11 = scmp.ne.s32.totalorder %s27_s12, %s104_s30  ;;  %p110_p13 = scmp.lt.s32.totalorder %s104_s30, %s104_s30 }
  0x1c   :  { %p111_p0 = por %p110_p13, %p109_p12 }
  0x1e   :  { %p112_p1 = pnand %p111_p0, %p105_p11 }
  0x20   :  { %115 = shalt.err (!%p112_p1)
}
  0x21   :  { %29 = dma.hbm_to_vmem [thread:$0]  %s199_s1, 128, %s27_s12, [#allocation6]  }
  0x22   :  { %138 = dma.done.wait [#allocation3], 128  }
  0x23   :  { %139 = vsyncadd [#allocation3], 4294967168 }
  0x24   :  { %140 = dma.done.wait [#allocation6], 128  }
  0x25   :  { %141 = vsyncadd [#allocation6], 4294967168  ;;  %v36_v0 = vld [vmem:[#allocation2] sm:$0xff]  ;;  %v37_v1 = vld [vmem:[#allocation5] sm:$0xff]  ;;  %vm39_vm0 = vcmask 261120   ;;  %v44_v4 = vlaneseq  ;;  %s146_s4 = smov [#allocation7]  }
  0x26   :  { %v38_v2 = vmul.f32 %v37_v1, %v36_v0  ;;  %s59_s5 = sshll.u32 %s146_s4, 4  ;;  %vm51_vm1 = vcmask 57344   ;;  %s60_s5 = int_to_ptr.vmem [resolvable:$true] %s59_s5 }
  0x27   :  { %v45_v5 = vand.u32 127, %v44_v4  ;;  %v47_v6 = vshrl.u32 %v44_v4, 7  ;;  %s116_s1 = scalar_lea.vmem %s60_s5, 16  ;;  %s120_s6 = scalar_lea.vmem %s60_s5, 32 }
  0x28   :  { %v40_v3 = vsel %vm39_vm0, %v38_v2, 0.0  ;;  %p117_p2 = scmp.ne.s32.totalorder %s60_s5, %s116_s1  ;;  %p121_p3 = scmp.lt.s32.totalorder %s60_s5, %s60_s5 }
  0x29   :  { %41 = vadd.xlane.f32.xlu0 %v40_v3  ;;  %v48_v7 = vsub.s32 %v45_v5, %v47_v6  ;;  %p122_p4 = scmp.lt.s32.totalorder %s120_s6, %s116_s1 }
  0x2b   :  { %p123_p5 = por %p122_p4, %p121_p3 }
  0x2d   :  { %p124_p6 = pnand %p123_p5, %p117_p2 }
  0xb6   :  { %v42_v8 = vpop.xlane.xlu0 %41 }
  0xb7   :  { %v49_v9 = vrot.slane %v42_v8, %v48_v7 }
  0xb9   :  { %52 = vst.msk [vmem:[#allocation7] sm:$0x1] %vm51_vm1, %v49_v9 }
  0xba   :  { %127 = shalt.err (!%p124_p6)
}
  0xbb   :  { %s128_s9 = scalar_lea.hbm %s200_s2, 16 }
  0xbc   :  { %p129_p7 = scmp.ne.s32.totalorder %s200_s2, %s128_s9  ;;  %p132_p8 = scmp.lt.u32.totalorder %s128_s9, %s200_s2 }
  0xbe   :  { %p134_p9 = pnand %p132_p8, %p129_p7 }
  0xc0   :  { %137 = shalt.err (!%p134_p9)
}
  0xc1   :  { %62 = dma.vmem_to_hbm [thread:$0]  %s60_s5, 16, %s200_s2, [#allocation4]  }
  0xc2   :  { %142 = dma.done.wait [#allocation4], 16  }
  0xc3   :  { %143 = vsyncadd [#allocation4], 4294967280 }
  0xc4   :  { %66 = vsyncpa [#allocation3], 1 }
  0xc5   :  { %67 = vsyncpa [#allocation6], 1 }
  0xc6   :  { %68 = vsyncpa [#allocation4], 1 }

</bundles_post_ra>
